<compile_context>
chip_gen: v5e
topology: v5e:2x2
jax: 0.10.0
libtpu: 0.0.40
codegen_flags: <defaults>
</compile_context>

<pallas_src>
import functools

import jax
import jax.numpy as jnp
from jax import lax
from jax.experimental import pallas as pl
from jax.experimental.pallas import tpu as pltpu

_LANES = 128


def _cut_bce_block_kernel(threshold, full_rows, rem_cols, needs_mask, block_rows,
                          x_ref, t_ref, out_ref):
    i = pl.program_id(0)

    # Cast to f32 on load (free VPU work, hidden under the DMA).
    x = x_ref[...].astype(jnp.float32)
    t = t_ref[...].astype(jnp.float32)

    # --- the "cut": zero logits whose signed margin exceeds the threshold ---
    y = x * (t - 0.5)
    x_cut = jnp.where(y > threshold, 0.0, x)

    # --- numerically stable BCE-with-logits (same form PyTorch uses) ---
    #     loss = max(x, 0) - x * t + log1p(exp(-|x|))
    loss = (jnp.maximum(x_cut, 0.0) - x_cut * t
            + jnp.log1p(jnp.exp(-jnp.abs(x_cut))))

    def fold(v):
        # (block_rows, 128) -> (8, 128) partial sum: pure vreg adds (no XLU reduce).
        return v.reshape(block_rows // 8, 8, _LANES).sum(axis=0)

    if needs_mask:
        last = pl.num_programs(0) - 1

        @pl.when(i == last)
        def _masked():
            # Padding / edge-block overhang only exists in the last block.
            grow = (lax.broadcasted_iota(jnp.int32, loss.shape, 0)
                    + i * block_rows)
            col = lax.broadcasted_iota(jnp.int32, loss.shape, 1)
            valid = jnp.logical_or(
                grow < full_rows,
                jnp.logical_and(grow == full_rows, col < rem_cols))
            out_ref[...] = fold(jnp.where(valid, loss, 0.0))

        @pl.when(i != last)
        def _fast():
            out_ref[...] = fold(loss)
    else:
        out_ref[...] = fold(loss)


def cut_bce_loss(x, target, threshold, *, block_rows=4096):
    """Pallas equivalent of `CutBCELoss(threshold)(x, target)` -> scalar loss (f32).

    # TODO(synk): PyTorch also mutates `x` in place (x[y > threshold] = 0); a pure JAX
    # function only reproduces the returned loss value, not that side effect.
    """
    assert x.shape == target.shape, "x and target must have the same shape"
    n = int(x.size)
    assert n > 0

    # Stream native dtypes; cast happens inside the kernel.
    x_flat = jnp.ravel(x)
    t_flat = jnp.ravel(target)

    # Sublane granularity for the narrowest streamed dtype: f32 -> 8, bf16 -> 16, i8 -> 32.
    itemsize = min(x_flat.dtype.itemsize, t_flat.dtype.itemsize)
    sub = 8 * max(1, 4 // max(1, itemsize))

    rows = pl.cdiv(n, _LANES)
    rows_padded = pl.cdiv(rows, sub) * sub          # pad only to the min-tile row count

    pad = rows_padded * _LANES - n
    if pad:
        x_flat = jnp.pad(x_flat, (0, pad))
        t_flat = jnp.pad(t_flat, (0, pad))
    x2 = x_flat.reshape(rows_padded, _LANES)
    t2 = t_flat.reshape(rows_padded, _LANES)

    # Block size: multiple of `sub`; single full-array block for small inputs.
    block_rows = max(sub, (int(block_rows) // sub) * sub)
    if rows_padded <= block_rows:
        block_rows = rows_padded
    n_blocks = pl.cdiv(rows_padded, block_rows)      # edge block allowed (ragged tail)

    full_rows = n // _LANES
    rem_cols = n % _LANES
    needs_mask = (pad != 0) or (n_blocks * block_rows != rows_padded)

    kernel = functools.partial(_cut_bce_block_kernel, float(threshold),
                               full_rows, rem_cols, needs_mask, block_rows)

    bytes_in = n * (x_flat.dtype.itemsize + t_flat.dtype.itemsize)
    partials = pl.pallas_call(
        kernel,
        out_shape=jax.ShapeDtypeStruct((n_blocks * 8, _LANES), jnp.float32),
        grid_spec=pltpu.PrefetchScalarGridSpec(
            num_scalar_prefetch=0,
            grid=(n_blocks,),
            in_specs=[
                pl.BlockSpec((block_rows, _LANES), lambda i: (i, 0)),
                pl.BlockSpec((block_rows, _LANES), lambda i: (i, 0)),
            ],
            out_specs=pl.BlockSpec((8, _LANES), lambda i: (i, 0)),
        ),
        compiler_params=pltpu.CompilerParams(
            # Blocks are independent (per-block partial sums) -> megacore can shard them.
            dimension_semantics=("parallel",),
            vmem_limit_bytes=32 * 1024 * 1024,
        ),
        cost_estimate=pl.CostEstimate(
            flops=9 * n,
            transcendentals=2 * n,
            bytes_accessed=bytes_in + n_blocks * 8 * _LANES * 4,
        ),
    )(x2, t2)

    # Tiny final reduction (n_blocks * 1024 f32 values) + mean normalization.
    return jnp.sum(partials) * (1.0 / n)


def _reference_cut_bce(x, target, threshold):
    x = x.astype(jnp.float32)
    t = target.astype(jnp.float32)
    y = x * (t - 0.5)
    x_cut = jnp.where(y > threshold, 0.0, x)
    loss = (jnp.maximum(x_cut, 0.0) - x_cut * t
            + jnp.log1p(jnp.exp(-jnp.abs(x_cut))))
    return jnp.mean(loss)


if __name__ == "__main__":
    threshold = 2.0

    key = jax.random.PRNGKey(0)
    kx, kt, kx2, kt2, kx3, kt3 = jax.random.split(key, 6)

    # Main case: NCHW-style logits [2, 4, 16, 16] (2048 elems -> lane-aligned, copy-free).
    x = 4.0 * jax.random.normal(kx, (2, 4, 16, 16), jnp.float32)
    target = jax.random.bernoulli(kt, 0.5, (2, 4, 16, 16)).astype(jnp.float32)
    loss = jax.block_until_ready(cut_bce_loss(x, target, threshold))
    ref = _reference_cut_bce(x, target, threshold)
    assert loss.shape == ()
    assert jnp.allclose(loss, ref, atol=1e-5, rtol=1e-5), (loss, ref)

    # Ragged case: exercises min-tile padding + last-block mask.
    x_r = 4.0 * jax.random.normal(kx2, (5, 37), jnp.float32)
    t_r = jax.random.bernoulli(kt2, 0.3, (5, 37)).astype(jnp.float32)
    loss_r = jax.block_until_ready(cut_bce_loss(x_r, t_r, threshold))
    ref_r = _reference_cut_bce(x_r, t_r, threshold)
    assert jnp.allclose(loss_r, ref_r, atol=1e-5, rtol=1e-5), (loss_r, ref_r)

    # bf16 streaming + multi-block grid with an overhanging edge block.
    x_b = (4.0 * jax.random.normal(kx3, (33, 40), jnp.float32)).astype(jnp.bfloat16)
    t_b = jax.random.bernoulli(kt3, 0.5, (33, 40)).astype(jnp.bfloat16)
    loss_b = jax.block_until_ready(cut_bce_loss(x_b, t_b, threshold, block_rows=16))
    ref_b = _reference_cut_bce(x_b, t_b, threshold)
    assert jnp.allclose(loss_b, ref_b, atol=1e-4, rtol=1e-4), (loss_b, ref_b)

    print("KERNEL_OK")
</pallas_src>

<mosaic_0001>
module attributes {stable_mosaic.version = 11 : i64} {
  func.func @_cut_bce_block_kernel(%arg0: i32, %arg1: memref<16x128xf32, #tpu.memory_space<vmem>>, %arg2: memref<16x128xf32, #tpu.memory_space<vmem>>, %arg3: memref<8x128xf32, #tpu.memory_space<vmem>>) attributes {dimension_semantics = [#tpu.dimension_semantics<parallel>], iteration_bounds = array<i64: 1>, scalar_prefetch = 0 : i64, scratch_operands = 0 : i64, tpu.core_type = #tpu.core_type<tc>, window_params = [{transform_indices = @transform_0, window_bounds = array<i64: 16, 128>}, {transform_indices = @transform_1, window_bounds = array<i64: 16, 128>}, {transform_indices = @transform_2, window_bounds = array<i64: 8, 128>}]} {
    %c0 = arith.constant 0 : index
    %c0_0 = arith.constant 0 : index
    %0 = vector.load %arg1[%c0, %c0_0] : memref<16x128xf32, #tpu.memory_space<vmem>>, vector<16x128xf32>
    %c0_1 = arith.constant 0 : index
    %c0_2 = arith.constant 0 : index
    %1 = vector.load %arg2[%c0_1, %c0_2] : memref<16x128xf32, #tpu.memory_space<vmem>>, vector<16x128xf32>
    %cst = arith.constant 5.000000e-01 : f32
    %2 = vector.broadcast %cst : f32 to vector<16x128xf32>
    %3 = arith.subf %1, %2 : vector<16x128xf32>
    %4 = arith.mulf %0, %3 : vector<16x128xf32>
    %cst_3 = arith.constant 2.000000e+00 : f32
    %5 = vector.broadcast %cst_3 : f32 to vector<16x128xf32>
    %6 = arith.cmpf ogt, %4, %5 : vector<16x128xf32>
    %cst_4 = arith.constant 0.000000e+00 : f32
    %7 = vector.broadcast %cst_4 : f32 to vector<16x128xf32>
    %8 = arith.select %6, %7, %0 : vector<16x128xi1>, vector<16x128xf32>
    %cst_5 = arith.constant 0.000000e+00 : f32
    %9 = vector.broadcast %cst_5 : f32 to vector<16x128xf32>
    %10 = arith.maximumf %8, %9 : vector<16x128xf32>
    %11 = arith.mulf %8, %1 : vector<16x128xf32>
    %12 = arith.subf %10, %11 : vector<16x128xf32>
    %13 = math.absf %8 : vector<16x128xf32>
    %cst_6 = arith.constant 0.000000e+00 : f32
    %14 = vector.broadcast %cst_6 : f32 to vector<16x128xf32>
    %15 = arith.subf %14, %13 : vector<16x128xf32>
    %16 = math.exp %15 : vector<16x128xf32>
    %17 = math.log1p %16 : vector<16x128xf32>
    %18 = arith.addf %12, %17 : vector<16x128xf32>
    %19 = vector.shape_cast %18 : vector<16x128xf32> to vector<2x8x128xf32>
    %cst_7 = arith.constant dense<0.000000e+00> : vector<8x128xf32>
    %20 = vector.multi_reduction <add>, %19, %cst_7 [0] : vector<2x8x128xf32> to vector<8x128xf32>
    %c0_8 = arith.constant 0 : index
    %c0_9 = arith.constant 0 : index
    %21 = vector.load %arg3[%c0_8, %c0_9] : memref<8x128xf32, #tpu.memory_space<vmem>>, vector<8x128xf32>
    tpu.vector_store %arg3[%c0_8, %c0_9], %20 {strides = array<i32>} : memref<8x128xf32, #tpu.memory_space<vmem>>, vector<8x128xf32>,
    return
  }
  func.func @transform_0(%arg0: i32) -> (i32, i32) {
    %c0_i32 = arith.constant 0 : i32
    %c0_i32_0 = arith.constant 0 : i32
    return %arg0, %c0_i32 : i32, i32
  }
  func.func @transform_1(%arg0: i32) -> (i32, i32) {
    %c0_i32 = arith.constant 0 : i32
    %c0_i32_0 = arith.constant 0 : i32
    return %arg0, %c0_i32 : i32, i32
  }
  func.func @transform_2(%arg0: i32) -> (i32, i32) {
    %c0_i32 = arith.constant 0 : i32
    %c0_i32_0 = arith.constant 0 : i32
    return %arg0, %c0_i32 : i32, i32
  }
}

</mosaic_0001>

<bundles_post_ra>
// kernel: tpu_custom_call.1
= control target key start
LH: loop header
LB: loop body
LE: loop exit
PB: predicated region body
PF: predicated region fallthrough
CT: control target
= control target key end

     0   :  { %7 = vsyncpa [#allocation3], 0  ;;  %s232_s0 = inlined_call_operand.hbm [shape: f32[16,128], index: 0, kind: input, shape index: {}]   ;;  %s233_s1 = inlined_call_operand.hbm [shape: f32[16,128], index: 1, kind: input, shape index: {}]   ;;  %s234_s2 = inlined_call_operand.hbm [shape: f32[8,128], index: 2, kind: output, shape index: {}]  }
   0x1   :  { %8 = vsyncpa [#allocation6], 0 }
   0x2   :  { %9 = vsyncpa [#allocation4], 0  ;;  %s14_s11 = sshll.u32 %s232_s0, 4  ;;  %s203_s12 = smov [#allocation2]   ;;  %s15_s11 = int_to_ptr.hbm [resolvable:$true] %s14_s11 }
   0x3   :  { %s16_s13 = sshll.u32 %s203_s12, 4  ;;  %s27_s16 = sshll.u32 %s233_s1, 4  ;;  %s17_s13 = int_to_ptr.vmem [resolvable:$true] %s16_s13  ;;  %s28_s16 = int_to_ptr.hbm [resolvable:$true] %s27_s16 }
   0x4   :  { %s204_s17 = smov 128   ;;  %s205_s18 = smov 8  }
   0x5   :  { %22 = dma.hbm_to_vmem [thread:$0]  %s15_s11, 256, %s17_s13, [#allocation3], %s204_s17, %s204_s17, %s205_s18  }
   0x6   :  { %s206_s19 = smov [#allocation5]  }
   0x7   :  { %s29_s20 = sshll.u32 %s206_s19, 4  ;;  %s30_s20 = int_to_ptr.vmem [resolvable:$true] %s29_s20 }
   0x8   :  { %35 = dma.hbm_to_vmem [thread:$0]  %s28_s16, 256, %s30_s20, [#allocation6], %s204_s17, %s204_s17, %s205_s18  }
   0x9   :  { %197 = dma.done.wait [#allocation3], 256  }
   0xa   :  { %198 = vsyncadd [#allocation3], 4294967040 }
   0xb   :  { %199 = dma.done.wait [#allocation6], 256  }
   0xc   :  { %200 = vsyncadd [#allocation6], 4294967040  ;;  %v44_v0 = vld [vmem:[#allocation2] sm:$0xff]  ;;  %v46_v1 = vld [vmem:[#allocation5] sm:$0xff]  ;;  %s207_s0 = smov [#allocation7]   ;;  %s99_s23 = sshll.u32 %s234_s2, 4  ;;  %s100_s23 = int_to_ptr.hbm [resolvable:$true] %s99_s23 }
   0xd   :  { %v45_v2 = vld [vmem:[#allocation2 + $0x8] sm:$0xff]  ;;  %v47_v3 = vld [vmem:[#allocation5 + $0x8] sm:$0xff]  ;;  %v110_v4 = vadd.f32 -0.5, %v46_v1  ;;  %s97_s1 = sshll.u32 %s207_s0, 4  ;;  %s98_s1 = int_to_ptr.vmem [resolvable:$true] %s97_s1 }
   0xe   :  { %v111_v5 = vadd.f32 -0.5, %v47_v3 }
   0xf   :  { %v50_v6 = vmul.f32 %v110_v4, %v44_v0 }
  0x10   :  { %v51_v7 = vmul.f32 %v111_v5, %v45_v2 }
  0x11   :  { %vm52_vm0 = vcmp.gt.f32.partialorder %v50_v6, 2.0 }
  0x12   :  { %vm53_vm1 = vcmp.gt.f32.partialorder %v51_v7, 2.0  ;;  %v54_v8 = vsel %vm52_vm0, 0.0, %v44_v0 }
  0x13   :  { %v55_v9 = vsel %vm53_vm1, 0.0, %v45_v2  ;;  %v62_v10 = vand.u32 2147483647, %v54_v8  ;;  %v56_v23 = vmax.f32 %v54_v8, 0.0  ;;  %v58_v24 = vmul.f32 %v54_v8, %v46_v1 }
  0x14   :  { %v63_v11 = vand.u32 2147483647, %v55_v9  ;;  %v57_v27 = vmax.f32 %v55_v9, 0.0  ;;  %v59_v28 = vmul.f32 %v55_v9, %v47_v3 }
  0x15   :  { %v64_v12 = vsub.f32 0.0, %v62_v10  ;;  %v60_v32 = vsub.f32 %v56_v23, %v58_v24 }
  0x16   :  { %v65_v13 = vsub.f32 0.0, %v63_v11  ;;  %v61_v35 = vsub.f32 %v57_v27, %v59_v28 }
  0x17   :  { %v66_v14 = vmul.f32 1.442695, %v64_v12 }
  0x18   :  { %v68_v15 = vmul.f32 1.442695, %v65_v13 }
  0x19   :  { %117 = vpow2.f32 %v66_v14 }
  0x1a   :  { %119 = vpow2.f32 %v68_v15 }
  0x1f   :  { %v118_v16 = vpop.eup %117 }
  0x20   :  { %v120_v17 = vpop.eup %119  ;;  %v70_v18 = vadd.f32 1.0, %v118_v16  ;;  %v73_v19 = vmul.f32 -0.5, %v118_v16  ;;  %v76_v25 = vand.u32 2147483647, %v118_v16 }
  0x21   :  { %v79_v20 = vadd.f32 1.0, %v120_v17  ;;  %v82_v21 = vmul.f32 -0.5, %v120_v17  ;;  %v85_v29 = vand.u32 2147483647, %v120_v17 }
  0x22   :  { %121 = vlog2.f32 %v70_v18  ;;  %v74_v22 = vadd.f32 1.0, %v73_v19  ;;  %vm77_vm2 = vcmp.lt.f32.partialorder %v76_v25, 0.0004427343 }
  0x23   :  { %123 = vlog2.f32 %v79_v20  ;;  %v83_v26 = vadd.f32 1.0, %v82_v21  ;;  %vm86_vm3 = vcmp.lt.f32.partialorder %v85_v29, 0.0004427343 }
  0x24   :  { %v75_v30 = vmul.f32 %v118_v16, %v74_v22 }
  0x25   :  { %v84_v33 = vmul.f32 %v120_v17, %v83_v26 }
  0x28   :  { %v122_v31 = vpop.eup %121 }
  0x29   :  { %v124_v34 = vpop.eup %123  ;;  %v72_v36 = vmul.f32 0.6931472, %v122_v31 }
  0x2a   :  { %v81_v37 = vmul.f32 0.6931472, %v124_v34 }
  0x2b   :  { %v78_v38 = vsel %vm77_vm2, %v75_v30, %v72_v36 }
  0x2c   :  { %v87_v39 = vsel %vm86_vm3, %v84_v33, %v81_v37  ;;  %v88_v40 = vadd.f32 %v78_v38, %v60_v32 }
  0x2d   :  { %v89_v41 = vadd.f32 %v87_v39, %v61_v35 }
  0x2f   :  { %v90_v42 = vadd.f32 %v89_v41, %v88_v40 }
  0x31   :  { %91 = vst [vmem:[#allocation7] sm:$0xff] %v90_v42 }
  0x32   :  { %102 = dma.vmem_to_hbm [thread:$0]  %s98_s1, 128, %s100_s23, [#allocation4]  }
  0x33   :  { %201 = dma.done.wait [#allocation4], 128  }
  0x34   :  { %202 = vsyncadd [#allocation4], 4294967168 }
  0x35   :  { %107 = vsyncpa [#allocation3], 1 }
  0x36   :  { %108 = vsyncpa [#allocation6], 1 }
  0x37   :  { %109 = vsyncpa [#allocation4], 1 }

</bundles_post_ra>
